<compile_context>
chip_gen: v7x
topology: tpu7x:2x2x1
jax: 0.10.0
libtpu: 0.0.40
codegen_flags: <defaults>
</compile_context>

<pallas_src>
import jax
import jax.numpy as jnp
from jax.experimental import pallas as pl
from jax.experimental.pallas import tpu as pltpu


def _round_up(v: int, m: int) -> int:
    return ((v + m - 1) // m) * m


def _vmem_budget_bytes() -> int:
    """Generation-aware scoped-VMEM budget (~60% of physical VMEM)."""
    try:
        cap = int(pltpu.get_tpu_info().vmem_capacity_bytes)
    except Exception:
        cap = 64 * 1024 * 1024  # conservative fallback (v7x per-TC VMEM)
    return int(cap * 0.6)


# --------------------------------------------------------------------------
# Kernels
# --------------------------------------------------------------------------
def _linear_head_kernel_f32out(x_ref, w_ref, b_ref, o_ref):
    """f32 output: accumulate directly into the resident output block.

    The output BlockSpec returns the same (i, j) block for every k, so the
    tile stays in VMEM across the contraction axis -- no scratch needed.
    """
    k = pl.program_id(2)

    @pl.when(k == 0)
    def _init():
        # Seed the accumulator with the broadcast bias -> no separate finalize.
        o_ref[...] = jnp.broadcast_to(b_ref[...], o_ref.shape)

    o_ref[...] += jnp.dot(x_ref[...], w_ref[...],
                          preferred_element_type=jnp.float32)


def _linear_head_kernel_acc(x_ref, w_ref, b_ref, o_ref, acc_ref):
    """Narrow-output path: f32 VMEM accumulator, bias + cast on last K step."""
    k = pl.program_id(2)

    @pl.when(k == 0)
    def _init():
        acc_ref[...] = jnp.zeros_like(acc_ref)

    acc_ref[...] += jnp.dot(x_ref[...], w_ref[...],
                            preferred_element_type=jnp.float32)

    @pl.when(k == pl.num_programs(2) - 1)
    def _finalize():
        o_ref[...] = (acc_ref[...] + b_ref[...]).astype(o_ref.dtype)


# --------------------------------------------------------------------------
# One-time parameter preprocessing (per weight, NOT per forward call)
# --------------------------------------------------------------------------
def prepare_linear_head(weight, bias, *, mxu_dtype=None,
                        tn_max=512, tk_max=1024):
    """Transpose (C,F)->(F,C), pad to tile-friendly sizes, optional cast.

    Call once at parameter-load time and reuse the returned dict for every
    forward call, so the weight transpose/pad HBM traffic is paid once.
    """
    C, F = weight.shape
    assert bias.shape == (C,)

    budget = _vmem_budget_bytes()
    itemsize = (jnp.dtype(mxu_dtype).itemsize if mxu_dtype is not None
                else jnp.dtype(weight.dtype).itemsize)

    tn = min(tn_max, _round_up(C, 128))   # lane multiple -> dense stores
    tk = min(tk_max, _round_up(F, 128))
    # Keep the double-buffered weight strip within half the VMEM budget;
    # the other half is for x / out / acc, sized per-call.
    while 2 * tk * tn * itemsize > budget // 2:
        if tk >= tn and tk > 128:
            tk = max(128, tk // 2)
        elif tn > 128:
            tn = max(128, tn // 2)
        else:
            break

    F_pad = _round_up(F, tk)
    C_pad = _round_up(C, tn)

    w = weight.T  # (F, C): natural (K, N) MXU operand -> no in-kernel transpose
    w_p = jnp.pad(w, ((0, F_pad - F), (0, C_pad - C)))
    if mxu_dtype is not None:
        w_p = w_p.astype(mxu_dtype)
    b_p = jnp.pad(bias, (0, C_pad - C)).astype(jnp.float32).reshape(1, C_pad)

    return dict(w=w_p, b=b_p, F=F, C=C, F_pad=F_pad, C_pad=C_pad,
                tn=tn, tk=tk, mxu_dtype=mxu_dtype, vmem_budget=budget)


# --------------------------------------------------------------------------
# Forward
# --------------------------------------------------------------------------
def linear_head(x, params, *, tm_max=256):
    """y = x @ weight.T + bias for x:(B, F). Returns (B, C) in x.dtype."""
    B, F = x.shape
    assert F == params["F"]
    C, F_pad, C_pad = params["C"], params["F_pad"], params["C_pad"]
    tn, tk = params["tn"], params["tk"]
    w_p, b_p = params["w"], params["b"]
    mxu_dtype = params["mxu_dtype"]
    budget = params["vmem_budget"]

    out_dtype = x.dtype
    use_scratch = out_dtype != jnp.float32
    in_itemsize = w_p.dtype.itemsize
    out_itemsize = jnp.dtype(out_dtype).itemsize

    def footprint(tm):
        return (2 * (tm * tk + tk * tn) * in_itemsize    # double-buffered x, w
                + 2 * tm * tn * out_itemsize             # double-buffered out
                + 2 * tn * 4                             # bias
                + (tm * tn * 4 if use_scratch else 0))   # f32 accumulator

    tm = min(tm_max, _round_up(B, 8))                    # sublane multiple
    while tm > 8 and footprint(tm) > budget:
        tm = max(8, _round_up(tm // 2, 8))

    # Avoid pathological M padding when B is just over a tile boundary.
    if B > tm:
        best_tm, best_pad = tm, _round_up(B, tm)
        lo = max(8, (tm // 2) // 8 * 8)
        for cand in range(tm, lo - 1, -8):
            pad = _round_up(B, cand)
            if pad < best_pad:
                best_pad, best_tm = pad, cand
        tm = best_tm

    B_pad = _round_up(B, tm)

    x_p = jnp.pad(x, ((0, B_pad - B), (0, F_pad - F)))
    if mxu_dtype is not None:
        x_p = x_p.astype(mxu_dtype)

    grid = (B_pad // tm, C_pad // tn, F_pad // tk)

    # HBM bytes including re-reads: x re-read per N tile, w per M tile.
    cost = pl.CostEstimate(
        flops=2 * B_pad * C_pad * F_pad,
        transcendentals=0,
        bytes_accessed=int(x_p.size * x_p.dtype.itemsize * grid[1]
                           + w_p.size * w_p.dtype.itemsize * grid[0]
                           + b_p.size * 4 * grid[0]
                           + B_pad * C_pad * out_itemsize),
    )

    in_specs = [
        pl.BlockSpec((tm, tk), lambda i, j, k: (i, k)),   # x tile   (M, K)
        pl.BlockSpec((tk, tn), lambda i, j, k: (k, j)),   # w tile   (K, N)
        pl.BlockSpec((1, tn), lambda i, j, k: (0, j)),    # bias row (1, N)
    ]
    out_spec = pl.BlockSpec((tm, tn), lambda i, j, k: (i, j))

    common = dict(
        out_shape=jax.ShapeDtypeStruct((B_pad, C_pad), out_dtype),
        grid=grid,
        in_specs=in_specs,
        out_specs=out_spec,
        compiler_params=pltpu.CompilerParams(
            dimension_semantics=("parallel", "parallel", "arbitrary"),
            vmem_limit_bytes=int(budget),
        ),
        cost_estimate=cost,
    )

    if use_scratch:
        out_padded = pl.pallas_call(
            _linear_head_kernel_acc,
            scratch_shapes=[pltpu.VMEM((tm, tn), jnp.float32)],
            **common,
        )(x_p, w_p, b_p)
    else:
        out_padded = pl.pallas_call(
            _linear_head_kernel_f32out,
            **common,
        )(x_p, w_p, b_p)

    return out_padded[:B, :C]


# --------------------------------------------------------------------------
if __name__ == "__main__":
    # LinearHead implies: inFeatures=32, numClasses=10; pick batch=8.
    B, F, C = 8, 32, 10
    key = jax.random.PRNGKey(0)
    kx, kw, kb = jax.random.split(key, 3)

    x = jax.random.normal(kx, (B, F), dtype=jnp.float32)
    # Deterministic init mirroring torch.nn.Linear's U(-1/sqrt(F), 1/sqrt(F)).
    bound = 1.0 / (F ** 0.5)
    weight = jax.random.uniform(kw, (C, F), jnp.float32, -bound, bound)
    bias = jax.random.uniform(kb, (C,), jnp.float32, -bound, bound)

    ref = x @ weight.T + bias

    # f32 path (direct accumulation into the f32 output block, no scratch).
    params_f32 = prepare_linear_head(weight, bias)
    out = jax.block_until_ready(linear_head(x, params_f32))
    assert out.shape == (B, C)
    assert jnp.allclose(out, ref, atol=1e-5, rtol=1e-5)

    # bf16-operand / f32-output path (recommended on v5e/v6e/v7x).
    params_bf16 = prepare_linear_head(weight, bias, mxu_dtype=jnp.bfloat16)
    out_bf16 = jax.block_until_ready(linear_head(x, params_bf16))
    assert out_bf16.shape == (B, C)
    assert jnp.allclose(out_bf16, ref, atol=5e-2, rtol=5e-2)

    # Slightly bigger (still small) case forcing a 2-step K grid, covering
    # both the f32 direct-accumulate path and the bf16-output scratch path.
    B2, F2, C2 = 24, 256, 40
    kx2, kw2, kb2 = jax.random.split(jax.random.PRNGKey(1), 3)
    x2 = jax.random.normal(kx2, (B2, F2), dtype=jnp.float32)
    w2 = jax.random.normal(kw2, (C2, F2), dtype=jnp.float32) * (1.0 / F2 ** 0.5)
    b2 = jax.random.normal(kb2, (C2,), dtype=jnp.float32)
    ref2 = x2 @ w2.T + b2

    params2 = prepare_linear_head(w2, b2, tn_max=128, tk_max=128)
    out2 = jax.block_until_ready(linear_head(x2, params2))
    assert out2.shape == (B2, C2)
    assert jnp.allclose(out2, ref2, atol=1e-4, rtol=1e-4)

    params2_bf16 = prepare_linear_head(w2, b2, mxu_dtype=jnp.bfloat16,
                                       tn_max=128, tk_max=128)
    out2_bf16 = jax.block_until_ready(
        linear_head(x2.astype(jnp.bfloat16), params2_bf16))
    assert out2_bf16.shape == (B2, C2)
    assert jnp.allclose(out2_bf16.astype(jnp.float32), ref2,
                        atol=1e-1, rtol=1e-1)

    print("KERNEL_OK")
</pallas_src>

<mosaic_0001>
module attributes {stable_mosaic.version = 11 : i64} {
  func.func @_linear_head_kernel_f32out(%arg0: i32, %arg1: i32, %arg2: i32, %arg3: memref<8x128xf32, #tpu.memory_space<vmem>>, %arg4: memref<128x128xf32, #tpu.memory_space<vmem>>, %arg5: memref<1x128xf32, #tpu.memory_space<vmem>>, %arg6: memref<8x128xf32, #tpu.memory_space<vmem>>) attributes {dimension_semantics = [#tpu.dimension_semantics<parallel>, #tpu.dimension_semantics<parallel>, #tpu.dimension_semantics<arbitrary>], iteration_bounds = array<i64: 1, 1, 1>, scalar_prefetch = 0 : i64, scratch_operands = 0 : i64, tpu.core_type = #tpu.core_type<tc>, window_params = [{transform_indices = @transform_0, window_bounds = array<i64: 8, 128>}, {transform_indices = @transform_1, window_bounds = array<i64: 128, 128>}, {transform_indices = @transform_2, window_bounds = array<i64: 1, 128>}, {transform_indices = @transform_3, window_bounds = array<i64: 8, 128>}]} {
    %c0_i32 = arith.constant 0 : i32
    %0 = arith.cmpi eq, %arg2, %c0_i32 : i32
    %1 = arith.extui %0 : i1 to i32
    %c0_i32_0 = arith.constant 0 : i32
    %2 = arith.cmpi ne, %1, %c0_i32_0 : i32
    scf.if %2 {
      %c0_8 = arith.constant 0 : index
      %c0_9 = arith.constant 0 : index
      %9 = vector.load %arg5[%c0_8, %c0_9] : memref<1x128xf32, #tpu.memory_space<vmem>>, vector<1x128xf32>
      %10 = vector.shape_cast %9 : vector<1x128xf32> to vector<1x128xf32>
      %11 = vector.broadcast %10 : vector<1x128xf32> to vector<8x128xf32>
      %c0_10 = arith.constant 0 : index
      %c0_11 = arith.constant 0 : index
      %12 = vector.load %arg6[%c0_10, %c0_11] : memref<8x128xf32, #tpu.memory_space<vmem>>, vector<8x128xf32>
      tpu.vector_store %arg6[%c0_10, %c0_11], %11 {strides = array<i32>} : memref<8x128xf32, #tpu.memory_space<vmem>>, vector<8x128xf32>,
    } else {
    }
    %c0 = arith.constant 0 : index
    %c0_1 = arith.constant 0 : index
    %3 = vector.load %arg6[%c0, %c0_1] : memref<8x128xf32, #tpu.memory_space<vmem>>, vector<8x128xf32>
    %c0_2 = arith.constant 0 : index
    %c0_3 = arith.constant 0 : index
    %4 = vector.load %arg3[%c0_2, %c0_3] : memref<8x128xf32, #tpu.memory_space<vmem>>, vector<8x128xf32>
    %c0_4 = arith.constant 0 : index
    %c0_5 = arith.constant 0 : index
    %5 = vector.load %arg4[%c0_4, %c0_5] : memref<128x128xf32, #tpu.memory_space<vmem>>, vector<128x128xf32>
    %cst = arith.constant dense<0.000000e+00> : vector<8x128xf32>
    %6 = tpu.matmul %4, %5, %cst {dimension_numbers = #tpu.dot_dimension_numbers<[1], [0], [0], [1], [0, 0, 1, 1], [], []>} : vector<8x128xf32>, vector<128x128xf32>, vector<8x128xf32> -> vector<8x128xf32>
    %7 = arith.addf %3, %6 : vector<8x128xf32>
    %c0_6 = arith.constant 0 : index
    %c0_7 = arith.constant 0 : index
    %8 = vector.load %arg6[%c0_6, %c0_7] : memref<8x128xf32, #tpu.memory_space<vmem>>, vector<8x128xf32>
    tpu.vector_store %arg6[%c0_6, %c0_7], %7 {strides = array<i32>} : memref<8x128xf32, #tpu.memory_space<vmem>>, vector<8x128xf32>,
    return
  }
  func.func @transform_0(%arg0: i32, %arg1: i32, %arg2: i32) -> (i32, i32) {
    %c0_i32 = arith.constant 0 : i32
    return %arg0, %arg2 : i32, i32
  }
  func.func @transform_1(%arg0: i32, %arg1: i32, %arg2: i32) -> (i32, i32) {
    %c0_i32 = arith.constant 0 : i32
    return %arg2, %arg1 : i32, i32
  }
  func.func @transform_2(%arg0: i32, %arg1: i32, %arg2: i32) -> (i32, i32) {
    %c0_i32 = arith.constant 0 : i32
    %c0_i32_0 = arith.constant 0 : i32
    return %c0_i32, %arg1 : i32, i32
  }
  func.func @transform_3(%arg0: i32, %arg1: i32, %arg2: i32) -> (i32, i32) {
    %c0_i32 = arith.constant 0 : i32
    return %arg0, %arg1 : i32, i32
  }
}

</mosaic_0001>

<bundles_post_ra>
// kernel: tpu_custom_call.1
= control target key start
LH: loop header
LB: loop body
LE: loop exit
PB: predicated region body
PF: predicated region fallthrough
CT: control target
= control target key end

     0   :  { %8 = vsyncpa [#allocation3], 0  ;;  %s390_s0 = inlined_call_operand.hbm [shape: f32[8,128], index: 0, kind: input, shape index: {}]   ;;  %s391_s1 = inlined_call_operand.hbm [shape: f32[128,128], index: 1, kind: input, shape index: {}]   ;;  %s392_s2 = inlined_call_operand.vmem [shape: f32[1,128], index: 2, kind: input, shape index: {}]   ;;  %s393_s3 = inlined_call_operand.hbm [shape: f32[8,128], index: 3, kind: output, shape index: {}]  }
   0x1   :  { %9 = vsyncpa [#allocation6], 0 }
   0x2   :  { %10 = vsyncpa [#allocation4], 0  ;;  %s316_s12 = smov [#allocation2]   ;;  %s317_s14 = smov [#allocation5]  }
   0x3   :  { %s17_s13 = sshll.u32 %s316_s12, 4  ;;  %s26_s15 = sshll.u32 %s317_s14, 4  ;;  %s18_s13 = int_to_ptr.vmem [resolvable:$true] %s17_s13  ;;  %s344_s15 = int_to_ptr.vmem [resolvable:$true] %s26_s15 }
   0x4   :  { %s244_s18 = scalar_lea.hbm %s390_s0, 128 }
   0x5   :  { %p245_p0 = scmp.ne.s32.totalorder %s390_s0, %s244_s18  ;;  %p248_p1 = scmp.lt.u32.totalorder %s244_s18, %s390_s0 }
   0x7   :  { %p250_p2 = pnand %p248_p1, %p245_p0 }
   0x9   :  { %253 = shalt.err (!%p250_p2)
}
   0xa   :  { %s254_s23 = scalar_lea.vmem %s18_s13, 128  ;;  %p259_p4 = scmp.lt.s32.totalorder %s18_s13, %s18_s13 }
   0xb   :  { %p255_p3 = scmp.ne.s32.totalorder %s18_s13, %s254_s23  ;;  %p260_p5 = scmp.lt.s32.totalorder %s254_s23, %s254_s23 }
   0xd   :  { %p261_p6 = por %p260_p5, %p259_p4 }
   0xf   :  { %p262_p7 = pnand %p261_p6, %p255_p3 }
  0x11   :  { %265 = shalt.err (!%p262_p7)
}
  0x12   :  { %20 = dma.hbm_to_vmem [thread:$0]  %s390_s0, 128, %s18_s13, [#allocation3]  }
  0x13   :  { %s266_s28 = scalar_lea.hbm %s391_s1, 2048 }
  0x14   :  { %p267_p8 = scmp.ne.s32.totalorder %s391_s1, %s266_s28  ;;  %p270_p9 = scmp.lt.u32.totalorder %s266_s28, %s391_s1 }
  0x16   :  { %p272_p10 = pnand %p270_p9, %p267_p8 }
  0x18   :  { %275 = shalt.err (!%p272_p10)
}
  0x19   :  { %s276_s6 = scalar_lea.vmem %s344_s15, 2048  ;;  %p281_p12 = scmp.lt.s32.totalorder %s344_s15, %s344_s15 }
  0x1a   :  { %p277_p11 = scmp.ne.s32.totalorder %s344_s15, %s276_s6  ;;  %p282_p13 = scmp.lt.s32.totalorder %s276_s6, %s276_s6 }
  0x1c   :  { %p283_p0 = por %p282_p13, %p281_p12 }
  0x1e   :  { %p284_p1 = pnand %p283_p0, %p277_p11 }
  0x20   :  { %287 = shalt.err (!%p284_p1)
}
  0x21   :  { %s318_s0 = smov 128   ;;  %s319_s7 = smov 8  }
  0x22   :  { %32 = dma.hbm_to_vmem [thread:$0]  %s391_s1, 2048, %s344_s15, [#allocation6], %s318_s0, %s318_s0, %s319_s7  }
  0x23   :  { %310 = dma.done.wait [#allocation3], 128  }
  0x24   :  { %311 = vsyncadd [#allocation3], 4294967168 }
  0x25   :  { %312 = dma.done.wait [#allocation6], 2048  }
  0x26   :  { %313 = vsyncadd [#allocation6], 4294965248  ;;  %v320_v0 = vmov 0.0|0.0   ;;  %vm321_vm0 = vmmov 0   ;;  %v322_v1 = vmov 0.0   ;;  %v55_v2 = vld [vmem:[#allocation5] sm:$0xff] }
  0x27   :  { %212 = vmatprep.subr.bf16.mxu0 %v320_v0  ;;  %209 = vmatprep.mubr.msk.f32.mxu0 %vm321_vm0, %v322_v1  ;;  %v56_v3 = vld [vmem:[#allocation5 + $0x8] sm:$0xff]  ;;  %v57_v4 = vld [vmem:[#allocation5 + $0x10] sm:$0xff]  ;;  %v58_v6 = vld [vmem:[#allocation5 + $0x18] sm:$0xff]  ;;  %s323_s11 = smov [#allocation7]  }
  0x28   :  { %v213_v5 = vpack.c.bf16 %v56_v3, %v55_v2  ;;  %v216_v7 = vpack.c.bf16 %v58_v6, %v57_v4  ;;  %v59_v8 = vld [vmem:[#allocation5 + $0x20] sm:$0xff]  ;;  %v60_v9 = vld [vmem:[#allocation5 + $0x28] sm:$0xff]  ;;  %v61_v11 = vld [vmem:[#allocation5 + $0x30] sm:$0xff]  ;;  %s149_s12 = sshll.u32 %s323_s11, 4  ;;  %s150_s12 = int_to_ptr.vmem [resolvable:$true] %s149_s12 }
  0x29   :  { %v219_v10 = vpack.c.bf16 %v60_v9, %v59_v8  ;;  %v62_v12 = vld [vmem:[#allocation5 + $0x38] sm:$0xff]  ;;  %v63_v14 = vld [vmem:[#allocation5 + $0x40] sm:$0xff]  ;;  %v64_v15 = vld [vmem:[#allocation5 + $0x48] sm:$0xff]  ;;  %s288_s13 = scalar_lea.vmem %s150_s12, 128  ;;  %p293_p3 = scmp.lt.s32.totalorder %s150_s12, %s150_s12 }
  0x2a   :  { %214 = vmatpush3.bf16.msra.mxu0 %v213_v5  ;;  %v222_v13 = vpack.c.bf16 %v62_v12, %v61_v11  ;;  %v225_v16 = vpack.c.bf16 %v64_v15, %v63_v14  ;;  %v65_v17 = vld [vmem:[#allocation5 + $0x50] sm:$0xff]  ;;  %v66_v18 = vld [vmem:[#allocation5 + $0x58] sm:$0xff]  ;;  %v67_v20 = vld [vmem:[#allocation5 + $0x60] sm:$0xff]  ;;  %p289_p2 = scmp.ne.s32.totalorder %s150_s12, %s288_s13  ;;  %p294_p4 = scmp.lt.s32.totalorder %s288_s13, %s288_s13 }
  0x2b   :  { %215 = vmatprep.subr.bf16.mxu0 %v320_v0  ;;  %v228_v19 = vpack.c.bf16 %v66_v18, %v65_v17  ;;  %v68_v21 = vld [vmem:[#allocation5 + $0x68] sm:$0xff]  ;;  %v69_v23 = vld [vmem:[#allocation5 + $0x70] sm:$0xff]  ;;  %v70_v24 = vld [vmem:[#allocation5 + $0x78] sm:$0xff] }
  0x2c   :  { %v231_v22 = vpack.c.bf16 %v68_v21, %v67_v20  ;;  %v234_v25 = vpack.c.bf16 %v70_v24, %v69_v23  ;;  %v54_v26 = vld [vmem:[#allocation2] sm:$0xff]  ;;  %p295_p5 = por %p294_p4, %p293_p3 }
  0x2d   :  { %v159_v27 = vld [vmem:[%s392_s2] ss:$0 sm:$0xff] }
  0x2e   :  { %217 = vmatpush3.bf16.msra.mxu0 %v216_v7  ;;  %p296_p6 = pnand %p295_p5, %p289_p2 }
  0x2f   :  { %218 = vmatprep.subr.bf16.mxu0 %v320_v0 }
  0x32   :  { %220 = vmatpush3.bf16.msra.mxu0 %v219_v10 }
  0x33   :  { %221 = vmatprep.subr.bf16.mxu0 %v320_v0 }
  0x36   :  { %223 = vmatpush3.bf16.msra.mxu0 %v222_v13 }
  0x37   :  { %224 = vmatprep.subr.bf16.mxu0 %v320_v0 }
  0x3a   :  { %226 = vmatpush3.bf16.msra.mxu0 %v225_v16 }
  0x3b   :  { %227 = vmatprep.subr.bf16.mxu0 %v320_v0 }
  0x3e   :  { %229 = vmatpush3.bf16.msra.mxu0 %v228_v19 }
  0x3f   :  { %230 = vmatprep.subr.bf16.mxu0 %v320_v0 }
  0x42   :  { %232 = vmatpush3.bf16.msra.mxu0 %v231_v22 }
  0x43   :  { %233 = vmatprep.subr.bf16.mxu0 %v320_v0 }
  0x46   :  { %235 = vmatpush3.bf16.msra.mxu0 %v234_v25 }
  0x49   :  { %210 = vmatmul.mubr.f32.vlgmr.msra.gmra.mrb[0].mxu0 %v54_v26 }
 0x11c   :  { %v137_v28 = vpop.f32.mrb[0].mxu0 }
 0x11d   :  { %v141_v29 = vadd.f32 %v159_v27, %v137_v28  ;;  %v211_v30 = vpop.f32.mrb[1].mxu0 }
 0x11f   :  { %142 = vst [vmem:[#allocation7] sm:$0xff] %v141_v29 }
 0x120   :  { %299 = shalt.err (!%p296_p6)
}
 0x121   :  { %s300_s16 = scalar_lea.hbm %s393_s3, 128 }
 0x122   :  { %p301_p7 = scmp.ne.s32.totalorder %s393_s3, %s300_s16  ;;  %p304_p8 = scmp.lt.u32.totalorder %s300_s16, %s393_s3 }
 0x124   :  { %p306_p9 = pnand %p304_p8, %p301_p7 }
 0x126   :  { %309 = shalt.err (!%p306_p9)
}
 0x127   :  { %152 = dma.vmem_to_hbm [thread:$0]  %s150_s12, 128, %s393_s3, [#allocation4]  }
 0x128   :  { %314 = dma.done.wait [#allocation4], 128  }
 0x129   :  { %315 = vsyncadd [#allocation4], 4294967168 }
 0x12a   :  { %156 = vsyncpa [#allocation3], 1 }
 0x12b   :  { %157 = vsyncpa [#allocation6], 1 }
 0x12c   :  { %158 = vsyncpa [#allocation4], 1 }

</bundles_post_ra>
